<compile_context>
chip_gen: v7x
topology: tpu7x:2x2x1
jax: 0.10.0
libtpu: 0.0.40
codegen_flags: <defaults>
</compile_context>

<pallas_src>
import math

import jax
import jax.numpy as jnp
from jax.experimental import pallas as pl
from jax.experimental.pallas import tpu as pltpu

D_IN = 784
D_H1 = 512
D_H2 = 128
D_OUT = 10
D_OUT_PAD = 128       # lane-dense output / full MXU tile for fc3


def _round_up(n, m):
    return (n + m - 1) // m * m


def mlp_kernel(x_ref, w1_ref, b1_ref, w2_ref, b2_ref, w3_ref, b3_ref, o_ref):
    # fc1 + ReLU : x tile is f32 in VMEM; cast to bf16 here (no HBM pre-pass).
    x = x_ref[...].astype(jnp.bfloat16)                       # (TB, 784)
    h1 = jnp.dot(x, w1_ref[...], preferred_element_type=jnp.float32)
    h1 = jnp.maximum(h1 + b1_ref[...], 0.0)                   # (TB, 512) f32

    # fc2 + ReLU : (TB, 512) @ (512, 128)
    h2 = jnp.dot(h1.astype(jnp.bfloat16), w2_ref[...],
                 preferred_element_type=jnp.float32)
    h2 = jnp.maximum(h2 + b2_ref[...], 0.0)                   # (TB, 128) f32

    # fc3 (N padded to 128); padded columns carry a -1e30 bias -> exp() == 0,
    # so no in-kernel iota/where mask and no -inf arithmetic.
    logits = jnp.dot(h2.astype(jnp.bfloat16), w3_ref[...],
                     preferred_element_type=jnp.float32)
    logits = logits + b3_ref[...]                              # (TB, 128) f32

    m = jnp.max(logits, axis=1, keepdims=True)
    e = jnp.exp(logits - m)
    denom = jnp.sum(e, axis=1, keepdims=True)
    probs = e * pl.reciprocal(denom, approx=True)              # EUP slot, ~free
    o_ref[...] = probs.astype(o_ref.dtype)


def prepare_params(params):
    """One-time preprocessing of fp32 Linear params into the kernel layout.

    Do this ONCE at init; mlp_forward then only streams the prepared arrays."""
    w1, b1, w2, b2, w3, b3 = params
    w1b = w1.astype(jnp.bfloat16)                              # (784, 512)
    w2b = w2.astype(jnp.bfloat16)                              # (512, 128)
    w3p = jnp.zeros((D_H2, D_OUT_PAD), jnp.bfloat16).at[:, :D_OUT].set(
        w3.astype(jnp.bfloat16))                               # (128, 128)
    b1f = b1.reshape(1, D_H1).astype(jnp.float32)
    b2f = b2.reshape(1, D_H2).astype(jnp.float32)
    # Padded logit columns get a large negative bias so softmax ignores them.
    b3p = jnp.full((1, D_OUT_PAD), -1e30, jnp.float32).at[:, :D_OUT].set(
        b3.reshape(1, D_OUT).astype(jnp.float32))
    return (w1b, b1f, w2b, b2f, w3p, b3p)


def mlp_forward(din, prepared_params, *, tile_b=1024):
    """din: (B, 1, 28, 28) float32 (NCHW). prepared_params: from prepare_params().
    Returns (B, 10) softmax probabilities (bfloat16)."""
    w1b, b1f, w2b, b2f, w3p, b3p = prepared_params
    x = din.reshape(-1, D_IN).astype(jnp.float32)              # == din.view(-1, 784)
    B = x.shape[0]

    # Batch tiling: multiples of 16 (bf16 sublane packing).  For moderately large
    # batches force >= 2 grid steps so v7x can shard across both TensorCores and
    # the DMA/compute pipeline has work to overlap; tiny batches stay 1 step.
    b16 = _round_up(max(B, 1), 16)
    tb = min(tile_b, b16)
    if b16 >= 256:
        tb = min(tb, _round_up(pl.cdiv(b16, 2), 16))
    b_pad = _round_up(B, tb)
    if b_pad != B:
        x = jnp.zeros((b_pad, D_IN), jnp.float32).at[:B].set(x)
    grid = (b_pad // tb,)

    flops = 2 * b_pad * (D_IN * D_H1 + D_H1 * D_H2 + D_H2 * D_OUT_PAD)
    bytes_accessed = (b_pad * D_IN * 4                      # x (f32, read in-kernel)
                      + (w1b.size + w2b.size + w3p.size) * 2
                      + (b1f.size + b2f.size + b3p.size) * 4
                      + b_pad * D_OUT_PAD * 2)              # bf16 output
    cost = pl.CostEstimate(flops=flops,
                           transcendentals=b_pad * D_OUT_PAD,
                           bytes_accessed=bytes_accessed)

    out = pl.pallas_call(
        mlp_kernel,
        out_shape=jax.ShapeDtypeStruct((b_pad, D_OUT_PAD), jnp.bfloat16),
        grid=grid,
        in_specs=[
            pl.BlockSpec((tb, D_IN), lambda i: (i, 0)),          # x tile (f32)
            pl.BlockSpec((D_IN, D_H1), lambda i: (0, 0)),        # w1 (resident)
            pl.BlockSpec((1, D_H1), lambda i: (0, 0)),           # b1
            pl.BlockSpec((D_H1, D_H2), lambda i: (0, 0)),        # w2 (resident)
            pl.BlockSpec((1, D_H2), lambda i: (0, 0)),           # b2
            pl.BlockSpec((D_H2, D_OUT_PAD), lambda i: (0, 0)),   # w3 (resident)
            pl.BlockSpec((1, D_OUT_PAD), lambda i: (0, 0)),      # b3 (pre-masked)
        ],
        out_specs=pl.BlockSpec((tb, D_OUT_PAD), lambda i: (i, 0)),
        compiler_params=pltpu.CompilerParams(
            dimension_semantics=("parallel",),
            vmem_limit_bytes=48 * 1024 * 1024),
        cost_estimate=cost,
    )(x, w1b, b1f, w2b, b2f, w3p, b3p)

    return out[:B, :D_OUT]


def init_params(key):
    """Deterministic init mimicking torch.nn.Linear defaults (uniform +-1/sqrt(fan_in)).
    Weights stored as (in_features, out_features); biases as (1, out_features)."""
    def linear(k, fan_in, fan_out):
        kw, kb = jax.random.split(k)
        bound = 1.0 / math.sqrt(fan_in)
        w = jax.random.uniform(kw, (fan_in, fan_out), jnp.float32, -bound, bound)
        b = jax.random.uniform(kb, (1, fan_out), jnp.float32, -bound, bound)
        return w, b

    k1, k2, k3 = jax.random.split(key, 3)
    w1, b1 = linear(k1, D_IN, D_H1)
    w2, b2 = linear(k2, D_H1, D_H2)
    w3, b3 = linear(k3, D_H2, D_OUT)
    return (w1, b1, w2, b2, w3, b3)


def mlp_reference(din, params):
    """Pure-JAX f32 reference for correctness check."""
    w1, b1, w2, b2, w3, b3 = params
    x = din.reshape(-1, D_IN)
    h1 = jax.nn.relu(x @ w1 + b1)
    h2 = jax.nn.relu(h1 @ w2 + b2)
    return jax.nn.softmax(h2 @ w3 + b3, axis=1)


if __name__ == "__main__":
    key = jax.random.PRNGKey(0)
    k_params, k_input = jax.random.split(key)

    params = init_params(k_params)
    prepared = prepare_params(params)          # one-time bf16/padded layout
    din = jax.random.normal(k_input, (2, 1, 28, 28), jnp.float32)  # NCHW MNIST-like

    out = mlp_forward(din, prepared)
    jax.block_until_ready(out)

    ref = mlp_reference(din, params)
    assert out.shape == (2, 10)
    # bf16 MXU inputs + bf16 output + approx reciprocal -> relaxed tolerance.
    out_f32 = out.astype(jnp.float32)
    assert jnp.allclose(out_f32, ref, atol=3e-2, rtol=3e-2)
    assert jnp.allclose(jnp.sum(out_f32, axis=1), 1.0, atol=2e-2)

    print("KERNEL_OK")
</pallas_src>

<mosaic_0001>
module attributes {stable_mosaic.version = 11 : i64} {
  func.func @mlp_kernel(%arg0: i32, %arg1: memref<16x784xf32, #tpu.memory_space<vmem>>, %arg2: memref<784x512xbf16, #tpu.memory_space<vmem>>, %arg3: memref<1x512xf32, #tpu.memory_space<vmem>>, %arg4: memref<512x128xbf16, #tpu.memory_space<vmem>>, %arg5: memref<1x128xf32, #tpu.memory_space<vmem>>, %arg6: memref<128x128xbf16, #tpu.memory_space<vmem>>, %arg7: memref<1x128xf32, #tpu.memory_space<vmem>>, %arg8: memref<16x128xbf16, #tpu.memory_space<vmem>>) attributes {dimension_semantics = [#tpu.dimension_semantics<parallel>], iteration_bounds = array<i64: 1>, scalar_prefetch = 0 : i64, scratch_operands = 0 : i64, tpu.core_type = #tpu.core_type<tc>, window_params = [{transform_indices = @transform_0, window_bounds = array<i64: 16, 784>}, {pipeline_mode = #tpu.pipeline_mode<synchronous>, transform_indices = @transform_1, window_bounds = array<i64: 784, 512>}, {pipeline_mode = #tpu.pipeline_mode<synchronous>, transform_indices = @transform_2, window_bounds = array<i64: 1, 512>}, {pipeline_mode = #tpu.pipeline_mode<synchronous>, transform_indices = @transform_3, window_bounds = array<i64: 512, 128>}, {pipeline_mode = #tpu.pipeline_mode<synchronous>, transform_indices = @transform_4, window_bounds = array<i64: 1, 128>}, {pipeline_mode = #tpu.pipeline_mode<synchronous>, transform_indices = @transform_5, window_bounds = array<i64: 128, 128>}, {pipeline_mode = #tpu.pipeline_mode<synchronous>, transform_indices = @transform_6, window_bounds = array<i64: 1, 128>}, {transform_indices = @transform_7, window_bounds = array<i64: 16, 128>}]} {
    %c0 = arith.constant 0 : index
    %c0_0 = arith.constant 0 : index
    %0 = vector.load %arg1[%c0, %c0_0] : memref<16x784xf32, #tpu.memory_space<vmem>>, vector<16x784xf32>
    %1 = arith.truncf %0 : vector<16x784xf32> to vector<16x784xbf16>
    %c0_1 = arith.constant 0 : index
    %c0_2 = arith.constant 0 : index
    %2 = vector.load %arg2[%c0_1, %c0_2] : memref<784x512xbf16, #tpu.memory_space<vmem>>, vector<784x512xbf16>
    %cst = arith.constant dense<0.000000e+00> : vector<16x512xf32>
    %3 = tpu.matmul %1, %2, %cst {dimension_numbers = #tpu.dot_dimension_numbers<[1], [0], [0], [1], [0, 0, 1, 1], [], []>} : vector<16x784xbf16>, vector<784x512xbf16>, vector<16x512xf32> -> vector<16x512xf32>
    %c0_3 = arith.constant 0 : index
    %c0_4 = arith.constant 0 : index
    %4 = vector.load %arg3[%c0_3, %c0_4] : memref<1x512xf32, #tpu.memory_space<vmem>>, vector<1x512xf32>
    %5 = vector.broadcast %4 : vector<1x512xf32> to vector<16x512xf32>
    %6 = arith.addf %3, %5 : vector<16x512xf32>
    %cst_5 = arith.constant 0.000000e+00 : f32
    %7 = vector.broadcast %cst_5 : f32 to vector<16x512xf32>
    %8 = arith.maximumf %6, %7 : vector<16x512xf32>
    %9 = arith.truncf %8 : vector<16x512xf32> to vector<16x512xbf16>
    %c0_6 = arith.constant 0 : index
    %c0_7 = arith.constant 0 : index
    %10 = vector.load %arg4[%c0_6, %c0_7] : memref<512x128xbf16, #tpu.memory_space<vmem>>, vector<512x128xbf16>
    %cst_8 = arith.constant dense<0.000000e+00> : vector<16x128xf32>
    %11 = tpu.matmul %9, %10, %cst_8 {dimension_numbers = #tpu.dot_dimension_numbers<[1], [0], [0], [1], [0, 0, 1, 1], [], []>} : vector<16x512xbf16>, vector<512x128xbf16>, vector<16x128xf32> -> vector<16x128xf32>
    %c0_9 = arith.constant 0 : index
    %c0_10 = arith.constant 0 : index
    %12 = vector.load %arg5[%c0_9, %c0_10] : memref<1x128xf32, #tpu.memory_space<vmem>>, vector<1x128xf32>
    %13 = vector.broadcast %12 : vector<1x128xf32> to vector<16x128xf32>
    %14 = arith.addf %11, %13 : vector<16x128xf32>
    %cst_11 = arith.constant 0.000000e+00 : f32
    %15 = vector.broadcast %cst_11 : f32 to vector<16x128xf32>
    %16 = arith.maximumf %14, %15 : vector<16x128xf32>
    %17 = arith.truncf %16 : vector<16x128xf32> to vector<16x128xbf16>
    %c0_12 = arith.constant 0 : index
    %c0_13 = arith.constant 0 : index
    %18 = vector.load %arg6[%c0_12, %c0_13] : memref<128x128xbf16, #tpu.memory_space<vmem>>, vector<128x128xbf16>
    %cst_14 = arith.constant dense<0.000000e+00> : vector<16x128xf32>
    %19 = tpu.matmul %17, %18, %cst_14 {dimension_numbers = #tpu.dot_dimension_numbers<[1], [0], [0], [1], [0, 0, 1, 1], [], []>} : vector<16x128xbf16>, vector<128x128xbf16>, vector<16x128xf32> -> vector<16x128xf32>
    %c0_15 = arith.constant 0 : index
    %c0_16 = arith.constant 0 : index
    %20 = vector.load %arg7[%c0_15, %c0_16] : memref<1x128xf32, #tpu.memory_space<vmem>>, vector<1x128xf32>
    %21 = vector.broadcast %20 : vector<1x128xf32> to vector<16x128xf32>
    %22 = arith.addf %19, %21 : vector<16x128xf32>
    %cst_17 = arith.constant dense<0xFF800000> : vector<16xf32>
    %23 = vector.multi_reduction <maximumf>, %22, %cst_17 [1] : vector<16x128xf32> to vector<16xf32>
    %24 = vector.shape_cast %23 : vector<16xf32> to vector<16x1xf32>
    %25 = vector.broadcast %24 : vector<16x1xf32> to vector<16x128xf32>
    %26 = arith.subf %22, %25 : vector<16x128xf32>
    %27 = math.exp %26 : vector<16x128xf32>
    %cst_18 = arith.constant dense<0.000000e+00> : vector<16xf32>
    %28 = vector.multi_reduction <add>, %27, %cst_18 [1] : vector<16x128xf32> to vector<16xf32>
    %29 = vector.shape_cast %28 : vector<16xf32> to vector<16x1xf32>
    %30 = tpu.reciprocal %29 {approx = true} : vector<16x1xf32> -> vector<16x1xf32>
    %31 = vector.broadcast %30 : vector<16x1xf32> to vector<16x128xf32>
    %32 = arith.mulf %27, %31 : vector<16x128xf32>
    %33 = arith.truncf %32 : vector<16x128xf32> to vector<16x128xbf16>
    %c0_19 = arith.constant 0 : index
    %c0_20 = arith.constant 0 : index
    %34 = vector.load %arg8[%c0_19, %c0_20] : memref<16x128xbf16, #tpu.memory_space<vmem>>, vector<16x128xbf16>
    tpu.vector_store %arg8[%c0_19, %c0_20], %33 {strides = array<i32>} : memref<16x128xbf16, #tpu.memory_space<vmem>>, vector<16x128xbf16>,
    return
  }
  func.func @transform_0(%arg0: i32) -> (i32, i32) {
    %c0_i32 = arith.constant 0 : i32
    %c0_i32_0 = arith.constant 0 : i32
    return %arg0, %c0_i32 : i32, i32
  }
  func.func @transform_1(%arg0: i32) -> (i32, i32) {
    %c0_i32 = arith.constant 0 : i32
    %c0_i32_0 = arith.constant 0 : i32
    %c0_i32_1 = arith.constant 0 : i32
    return %c0_i32, %c0_i32_0 : i32, i32
  }
  func.func @transform_2(%arg0: i32) -> (i32, i32) {
    %c0_i32 = arith.constant 0 : i32
    %c0_i32_0 = arith.constant 0 : i32
    %c0_i32_1 = arith.constant 0 : i32
    return %c0_i32, %c0_i32_0 : i32, i32
  }
  func.func @transform_3(%arg0: i32) -> (i32, i32) {
    %c0_i32 = arith.constant 0 : i32
    %c0_i32_0 = arith.constant 0 : i32
    %c0_i32_1 = arith.constant 0 : i32
    return %c0_i32, %c0_i32_0 : i32, i32
  }
  func.func @transform_4(%arg0: i32) -> (i32, i32) {
    %c0_i32 = arith.constant 0 : i32
    %c0_i32_0 = arith.constant 0 : i32
    %c0_i32_1 = arith.constant 0 : i32
    return %c0_i32, %c0_i32_0 : i32, i32
  }
  func.func @transform_5(%arg0: i32) -> (i32, i32) {
    %c0_i32 = arith.constant 0 : i32
    %c0_i32_0 = arith.constant 0 : i32
    %c0_i32_1 = arith.constant 0 : i32
    return %c0_i32, %c0_i32_0 : i32, i32
  }
  func.func @transform_6(%arg0: i32) -> (i32, i32) {
    %c0_i32 = arith.constant 0 : i32
    %c0_i32_0 = arith.constant 0 : i32
    %c0_i32_1 = arith.constant 0 : i32
    return %c0_i32, %c0_i32_0 : i32, i32
  }
  func.func @transform_7(%arg0: i32) -> (i32, i32) {
    %c0_i32 = arith.constant 0 : i32
    %c0_i32_0 = arith.constant 0 : i32
    return %arg0, %c0_i32 : i32, i32
  }
}

</mosaic_0001>

<bundles_post_ra>
// kernel: tpu_custom_call.1
= control target key start
LH: loop header
LB: loop body
LE: loop exit
PB: predicated region body
PF: predicated region fallthrough
CT: control target
= control target key end

     0   :  { %12 = vsyncpa [#allocation3], 0  ;;  %s3146_s0 = inlined_call_operand.hbm [shape: f32[16,784], index: 0, kind: input, shape index: {}]   ;;  %s3147_s1 = inlined_call_operand.hbm [shape: bf16[784,512], index: 1, kind: input, shape index: {}]   ;;  %s3148_s2 = inlined_call_operand.vmem [shape: f32[1,512], index: 2, kind: input, shape index: {}]   ;;  %s3149_s3 = inlined_call_operand.hbm [shape: bf16[512,128], index: 3, kind: input, shape index: {}]   ;;  %s3150_s4 = inlined_call_operand.vmem [shape: f32[1,128], index: 4, kind: input, shape index: {}]   ;;  %s3151_s5 = inlined_call_operand.hbm [shape: bf16[128,128], index: 5, kind: input, shape index: {}]   ;;  %s3152_s6 = inlined_call_operand.vmem [shape: f32[1,128], index: 6, kind: input, shape index: {}]   ;;  %s3153_s7 = inlined_call_operand.hbm [shape: bf16[16,128], index: 7, kind: output, shape index: {}]  }
   0x1   :  { %13 = vsyncpa [#allocation6], 0 }
   0x2   :  { %14 = vsyncpa [#allocation9], 0 }
   0x3   :  { %15 = vsyncpa [#allocation4], 0  ;;  %s2997_s24 = smov [#allocation5]   ;;  %s2879_s28 = scalar_lea.hbm %s3147_s1, 25088 }
   0x4   :  { %s33_s25 = sshll.u32 %s2997_s24, 4  ;;  %p2880_p0 = scmp.ne.s32.totalorder %s3147_s1, %s2879_s28  ;;  %s34_s25 = int_to_ptr.vmem [resolvable:$true] %s33_s25 }
   0x5   :  { %p2883_p1 = scmp.lt.u32.totalorder %s2879_s28, %s3147_s1 }
   0x7   :  { %p2885_p2 = pnand %p2883_p1, %p2880_p0 }
   0x9   :  { %2888 = shalt.err (!%p2885_p2)
}
   0xa   :  { %s2889_s10 = scalar_lea.vmem %s34_s25, 25088  ;;  %p2894_p4 = scmp.lt.s32.totalorder %s34_s25, %s34_s25 }
   0xb   :  { %p2890_p3 = scmp.ne.s32.totalorder %s34_s25, %s2889_s10  ;;  %p2895_p5 = scmp.lt.s32.totalorder %s2889_s10, %s2889_s10 }
   0xd   :  { %p2896_p6 = por %p2895_p5, %p2894_p4 }
   0xf   :  { %p2897_p7 = pnand %p2896_p6, %p2890_p3 }
  0x11   :  { %2900 = shalt.err (!%p2897_p7)
}
  0x12   :  { %s2998_s11 = smov 256   ;;  %s2999_s12 = smov 16  }
  0x13   :  { %39 = dma.hbm_to_vmem [thread:$0]  %s3147_s1, 25088, %s34_s25, [#allocation6], %s2998_s11, %s2998_s11, %s2999_s12  }
  0x14   :  { %s3000_s15 = smov [#allocation2]   ;;  %s2901_s19 = scalar_lea.hbm %s3146_s0, 1792 }
  0x15   :  { %s21_s16 = sshll.u32 %s3000_s15, 4  ;;  %p2902_p8 = scmp.ne.s32.totalorder %s3146_s0, %s2901_s19  ;;  %s22_s16 = int_to_ptr.vmem [resolvable:$true] %s21_s16 }
  0x16   :  { %p2905_p9 = scmp.lt.u32.totalorder %s2901_s19, %s3146_s0 }
  0x18   :  { %p2907_p10 = pnand %p2905_p9, %p2902_p8 }
  0x1a   :  { %2910 = shalt.err (!%p2907_p10)
}
  0x1b   :  { %s2911_s24 = scalar_lea.vmem %s22_s16, 1792  ;;  %p2916_p12 = scmp.lt.s32.totalorder %s22_s16, %s22_s16 }
  0x1c   :  { %p2912_p11 = scmp.ne.s32.totalorder %s22_s16, %s2911_s24  ;;  %p2917_p13 = scmp.lt.s32.totalorder %s2911_s24, %s2911_s24 }
  0x1e   :  { %p2918_p0 = por %p2917_p13, %p2916_p12 }
  0x20   :  { %p2919_p1 = pnand %p2918_p0, %p2912_p11 }
  0x22   :  { %2922 = shalt.err (!%p2919_p1)
}
  0x23   :  { %s3001_s1 = smov 896   ;;  %s3002_s25 = smov 56  }
  0x24   :  { %27 = dma.hbm_to_vmem [thread:$0]  %s3146_s0, 1792, %s22_s16, [#allocation3], %s3001_s1, %s3001_s1, %s3002_s25  }
  0x25   :  { %s3003_s28 = smov [#allocation7]   ;;  %s2923_s9 = scalar_lea.hbm %s3149_s3, 4096 }
  0x26   :  { %s47_s29 = sshll.u32 %s3003_s28, 4  ;;  %p2924_p2 = scmp.ne.s32.totalorder %s3149_s3, %s2923_s9  ;;  %s48_s29 = int_to_ptr.vmem [resolvable:$true] %s47_s29 }
  0x27   :  { %p2927_p3 = scmp.lt.u32.totalorder %s2923_s9, %s3149_s3 }
  0x29   :  { %p2929_p4 = pnand %p2927_p3, %p2924_p2 }
  0x2b   :  { %2932 = shalt.err (!%p2929_p4)
}
  0x2c   :  { %s2933_s14 = scalar_lea.vmem %s48_s29, 4096  ;;  %p2938_p6 = scmp.lt.s32.totalorder %s48_s29, %s48_s29 }
  0x2d   :  { %p2934_p5 = scmp.ne.s32.totalorder %s48_s29, %s2933_s14  ;;  %p2939_p7 = scmp.lt.s32.totalorder %s2933_s14, %s2933_s14 }
  0x2f   :  { %p2940_p8 = por %p2939_p7, %p2938_p6 }
  0x31   :  { %p2941_p9 = pnand %p2940_p8, %p2934_p5 }
  0x33   :  { %2944 = shalt.err (!%p2941_p9)
}
  0x34   :  { %s3004_s0 = smov 64   ;;  %s3005_s15 = smov 4  }
  0x35   :  { %53 = dma.hbm_to_vmem [thread:$0]  %s3149_s3, 4096, %s48_s29, [#allocation6], %s3004_s0, %s3004_s0, %s3005_s15  }
  0x36   :  { %s3006_s18 = smov [#allocation8]   ;;  %s2945_s22 = scalar_lea.hbm %s3151_s5, 1024 }
  0x37   :  { %s61_s19 = sshll.u32 %s3006_s18, 4  ;;  %p2946_p10 = scmp.ne.s32.totalorder %s3151_s5, %s2945_s22  ;;  %s62_s19 = int_to_ptr.vmem [resolvable:$true] %s61_s19 }
  0x38   :  { %p2949_p11 = scmp.lt.u32.totalorder %s2945_s22, %s3151_s5 }
  0x3a   :  { %p2951_p12 = pnand %p2949_p11, %p2946_p10 }
  0x3c   :  { %2954 = shalt.err (!%p2951_p12)
}
  0x3d   :  { %s2955_s26 = scalar_lea.vmem %s62_s19, 1024  ;;  %p2960_p0 = scmp.lt.s32.totalorder %s62_s19, %s62_s19 }
  0x3e   :  { %p2956_p13 = scmp.ne.s32.totalorder %s62_s19, %s2955_s26  ;;  %p2961_p1 = scmp.lt.s32.totalorder %s2955_s26, %s2955_s26 }
  0x40   :  { %p2962_p2 = por %p2961_p1, %p2960_p0 }
  0x42   :  { %p2963_p3 = pnand %p2962_p2, %p2956_p13 }
  0x44   :  { %2966 = shalt.err (!%p2963_p3)
}
  0x45   :  { %67 = dma.hbm_to_vmem [thread:$0]  %s3151_s5, 1024, %s62_s19, [#allocation9], %s3004_s0, %s3004_s0, %s3005_s15  }
  0x46   :  { %2989 = dma.done.wait [#allocation3], 1792  }
  0x47   :  { %2990 = vsyncadd [#allocation3], 4294965504 }
  0x48   :  { %2991 = dma.done.wait [#allocation6], 29184  }
  0x49   :  { %2992 = vsyncadd [#allocation6], 4294938112 }
  0x4a   :  { %2993 = dma.done.wait [#allocation9], 1024  }
  0x4b   :  { %2994 = vsyncadd [#allocation9], 4294966272  ;;  %v3007_v0 = vmov 0   ;;  %v2537_v1 = vld [vmem:[#allocation5 + $0x4] ss:$16 sps:$4 sm:$0xff]   ;;  %v96_v7 = vld [vmem:[#allocation2 + $0x68] sm:$0xff] }
  0x4c   :  { %1467 = vmatprep.mubr.bf16.mxu1 %v3007_v0  ;;  %v2539_v2 = vld [vmem:[#allocation5 + $0x604] ss:$16 sps:$4 sm:$0xff]   ;;  %1306 = vmatprep.subr.bf16.mxu0 %v2537_v1  ;;  %v2541_v3 = vld [vmem:[#allocation5] ss:$16 sps:$4 sm:$0xff]   ;;  %vm1302_vm0 = vcmask 130048   ;;  %v84_v52 = vld [vmem:[#allocation2 + $0x8] sm:$0xff] }
  0x4d   :  { %v2542_v4 = vld [vmem:[#allocation5 + $0x600] ss:$16 sps:$4 sm:$0xff]   ;;  %1435 = vmatprep.subr.bf16.mxu1 %v2539_v2  ;;  %v2543_v5 = vld [vmem:[#allocation5 + $0x24] ss:$16 sps:$4 sm:$0xff]   ;;  %1307 = vmatpush1.bf16.msra.mxu0 %v2541_v3  ;;  %v2545_v9 = vld [vmem:[#allocation5 + $0x8] ss:$16 sps:$4 sm:$0xff]  }
  0x4e   :  { %v89_v6 = vld [vmem:[#allocation2 + $0x30] sm:$0xff]  ;;  %1436 = vmatpush1.bf16.msra.mxu1 %v2542_v4  ;;  %1308 = vmatprep.subr.bf16.mxu0 %v2543_v5  ;;  %v2547_v10 = vld [vmem:[#allocation5 + $0xc] ss:$16 sps:$4 sm:$0xff]   ;;  %v2551_v13 = vld [vmem:[#allocation5 + $0x28] ss:$16 sps:$4 sm:$0xff]   ;;  %vm3009_vm1 = vmmov 0  }
  0x4f   :  { %v3106_v8 = vpack.c.bf16 %v96_v7, %v89_v6  ;;  %v2548_v11 = vld [vmem:[#allocation5 + $0x20] ss:$16 sps:$4 sm:$0xff]   ;;  %v2549_v12 = vld [vmem:[#allocation5 + $0x44] ss:$16 sps:$4 sm:$0xff]   ;;  %1478 = vmatprep.subr.bf16.mxu1 %v2547_v10  ;;  %v2553_v14 = vld [vmem:[#allocation5 + $0x2c] ss:$16 sps:$4 sm:$0xff]  }
  0x50   :  { %v2554_v15 = vld [vmem:[#allocation5 + $0x40] ss:$16 sps:$4 sm:$0xff]   ;;  %v2555_v16 = vld [vmem:[#allocation5 + $0x64] ss:$16 sps:$4 sm:$0xff]   ;;  %v2559_v17 = vld [vmem:[#allocation5 + $0x4c] ss:$16 sps:$4 sm:$0xff]  }
  0x51   :  { %2365 = vmatmul.mubr.msk.bf16.vlgmr.msra.gmra.mrb[0].mxu1 %vm1302_vm0, %v3106_v8  ;;  %1309 = vmatpush1.bf16.msra.mxu0 %v2548_v11  ;;  %v2557_v18 = vld [vmem:[#allocation5 + $0x48] ss:$16 sps:$4 sm:$0xff]   ;;  %v2560_v19 = vld [vmem:[#allocation5 + $0x60] ss:$16 sps:$4 sm:$0xff]   ;;  %v2561_v20 = vld [vmem:[#allocation5 + $0x84] ss:$16 sps:$4 sm:$0xff]  }
  0x52   :  { %1479 = vmatpush1.bf16.msra.mxu1 %v2545_v9  ;;  %1310 = vmatprep.subr.bf16.mxu0 %v2549_v12  ;;  %v2565_v21 = vld [vmem:[#allocation5 + $0x6c] ss:$16 sps:$4 sm:$0xff]   ;;  %v2563_v22 = vld [vmem:[#allocation5 + $0x68] ss:$16 sps:$4 sm:$0xff]   ;;  %v2566_v23 = vld [vmem:[#allocation5 + $0x80] ss:$16 sps:$4 sm:$0xff]  }
  0x53   :  { %1480 = vmatprep.subr.bf16.mxu1 %v2553_v14  ;;  %v2567_v24 = vld [vmem:[#allocation5 + $0xa4] ss:$16 sps:$4 sm:$0xff]   ;;  %v2571_v25 = vld [vmem:[#allocation5 + $0x8c] ss:$16 sps:$4 sm:$0xff]   ;;  %v2569_v26 = vld [vmem:[#allocation5 + $0x88] ss:$16 sps:$4 sm:$0xff]  }
  0x54   :  { %v2572_v27 = vld [vmem:[#allocation5 + $0xa0] ss:$16 sps:$4 sm:$0xff]   ;;  %v2573_v28 = vld [vmem:[#allocation5 + $0xc4] ss:$16 sps:$4 sm:$0xff]   ;;  %v2577_v29 = vld [vmem:[#allocation5 + $0xac] ss:$16 sps:$4 sm:$0xff]  }
  0x55   :  { %1311 = vmatpush1.bf16.msra.mxu0 %v2554_v15  ;;  %v2575_v30 = vld [vmem:[#allocation5 + $0xa8] ss:$16 sps:$4 sm:$0xff]   ;;  %v2578_v31 = vld [vmem:[#allocation5 + $0xc0] ss:$16 sps:$4 sm:$0xff]   ;;  %v2579_v32 = vld [vmem:[#allocation5 + $0xe4] ss:$16 sps:$4 sm:$0xff]  }
  0x56   :  { %1481 = vmatpush1.bf16.msra.mxu1 %v2551_v13  ;;  %1312 = vmatprep.subr.bf16.mxu0 %v2555_v16  ;;  %v2583_v33 = vld [vmem:[#allocation5 + $0xcc] ss:$16 sps:$4 sm:$0xff]   ;;  %v2581_v34 = vld [vmem:[#allocation5 + $0xc8] ss:$16 sps:$4 sm:$0xff]   ;;  %v2584_v35 = vld [vmem:[#allocation5 + $0xe0] ss:$16 sps:$4 sm:$0xff]  }
  0x57   :  { %1482 = vmatprep.subr.bf16.mxu1 %v2559_v17  ;;  %v2585_v36 = vld [vmem:[#allocation5 + $0x104] ss:$16 sps:$4 sm:$0xff]   ;;  %v2589_v37 = vld [vmem:[#allocation5 + $0xec] ss:$16 sps:$4 sm:$0xff]   ;;  %v2587_v38 = vld [vmem:[#allocation5 + $0xe8] ss:$16 sps:$4 sm:$0xff]  }
  0x58   :  { %v2590_v39 = vld [vmem:[#allocation5 + $0x100] ss:$16 sps:$4 sm:$0xff]   ;;  %v2591_v40 = vld [vmem:[#allocation5 + $0x124] ss:$16 sps:$4 sm:$0xff]   ;;  %v2595_v41 = vld [vmem:[#allocation5 + $0x10c] ss:$16 sps:$4 sm:$0xff]  }
  0x59   :  { %1313 = vmatpush1.bf16.msra.mxu0 %v2560_v19  ;;  %v2593_v42 = vld [vmem:[#allocation5 + $0x108] ss:$16 sps:$4 sm:$0xff]   ;;  %v2596_v43 = vld [vmem:[#allocation5 + $0x120] ss:$16 sps:$4 sm:$0xff]   ;;  %v2597_v44 = vld [vmem:[#allocation5 + $0x144] ss:$16 sps:$4 sm:$0xff]  }
  0x5a   :  { %1483 = vmatpush1.bf16.msra.mxu1 %v2557_v18  ;;  %1314 = vmatprep.subr.bf16.mxu0 %v2561_v20  ;;  %v2601_v45 = vld [vmem:[#allocation5 + $0x12c] ss:$16 sps:$4 sm:$0xff]   ;;  %v2599_v46 = vld [vmem:[#allocation5 + $0x128] ss:$16 sps:$4 sm:$0xff]   ;;  %v2602_v47 = vld [vmem:[#allocation5 + $0x140] ss:$16 sps:$4 sm:$0xff]  }
  0x5b   :  { %1484 = vmatprep.subr.bf16.mxu1 %v2565_v21  ;;  %v2603_v48 = vld [vmem:[#allocation5 + $0x164] ss:$16 sps:$4 sm:$0xff]   ;;  %v2607_v49 = vld [vmem:[#allocation5 + $0x14c] ss:$16 sps:$4 sm:$0xff]   ;;  %v2605_v50 = vld [vmem:[#allocation5 + $0x148] ss:$16 sps:$4 sm:$0xff]  }
  0x5c   :  { %v2608_v51 = vld [vmem:[#allocation5 + $0x160] ss:$16 sps:$4 sm:$0xff]   ;;  %v2609_v54 = vld [vmem:[#allocation5 + $0x184] ss:$16 sps:$4 sm:$0xff]   ;;  %v2613_v56 = vld [vmem:[#allocation5 + $0x16c] ss:$16 sps:$4 sm:$0xff]  }
  0x5d   :  { %1315 = vmatpush1.bf16.msra.mxu0 %v2566_v23  ;;  %v91_v53 = vld [vmem:[#allocation2 + $0x40] sm:$0xff]  ;;  %v2611_v57 = vld [vmem:[#allocation5 + $0x168] ss:$16 sps:$4 sm:$0xff]   ;;  %v2619_v60 = vld [vmem:[#allocation5 + $0x18c] ss:$16 sps:$4 sm:$0xff]  }
  0x5e   :  { %1485 = vmatpush1.bf16.msra.mxu1 %v2563_v22  ;;  %1316 = vmatprep.subr.bf16.mxu0 %v2567_v24  ;;  %v98_v55 = vpack.c.bf16 %v91_v53, %v84_v52  ;;  %v2614_v58 = vld [vmem:[#allocation5 + $0x180] ss:$16 sps:$4 sm:$0xff]   ;;  %v2615_v59 = vld [vmem:[#allocation5 + $0x1a4] ss:$16 sps:$4 sm:$0xff]   ;;  %v2617_v61 = vld [vmem:[#allocation5 + $0x188] ss:$16 sps:$4 sm:$0xff]  }
  0x5f   :  { %1486 = vmatprep.subr.bf16.mxu1 %v2571_v25  ;;  %v2620_v62 = vld [vmem:[#allocation5 + $0x1a0] ss:$16 sps:$4 sm:$0xff]   ;;  %v2621_v63 = vld [vmem:[#allocation5 + $0x1c4] ss:$16 sps:$4 sm:$0xff]   ;;  %v2625_v1 = vld [vmem:[#allocation5 + $0x1ac] ss:$16 sps:$4 sm:$0xff]  }
  0x60   :  { %1338 = vmatprep.mubr.bf16.mxu0 %v98_v55  ;;  %1510 = vmatprep.mubr.bf16.mxu1 %v98_v55  ;;  %v2623_v2 = vld [vmem:[#allocation5 + $0x1a8] ss:$16 sps:$4 sm:$0xff]   ;;  %v2626_v3 = vld [vmem:[#allocation5 + $0x1c0] ss:$16 sps:$4 sm:$0xff]   ;;  %v2627_v4 = vld [vmem:[#allocation5 + $0x1e4] ss:$16 sps:$4 sm:$0xff]  }
  0x61   :  { %1317 = vmatpush1.bf16.msra.mxu0 %v2572_v27  ;;  %v2631_v5 = vld [vmem:[#allocation5 + $0x1cc] ss:$16 sps:$4 sm:$0xff]   ;;  %v2629_v6 = vld [vmem:[#allocation5 + $0x1c8] ss:$16 sps:$4 sm:$0xff]   ;;  %v2632_v7 = vld [vmem:[#allocation5 + $0x1e0] ss:$16 sps:$4 sm:$0xff]  }
  0x62   :  { %1487 = vmatpush1.bf16.msra.mxu1 %v2569_v26  ;;  %1318 = vmatprep.subr.bf16.mxu0 %v2573_v28  ;;  %v83_v9 = vld [vmem:[#allocation2] sm:$0xff]  ;;  %v90_v10 = vld [vmem:[#allocation2 + $0x38] sm:$0xff] }
  0x63   :  { %1488 = vmatprep.subr.bf16.mxu1 %v2577_v29  ;;  %v2635_v11 = vld [vmem:[#allocation5 + $0x204] ss:$16 sps:$4 sm:$0xff]   ;;  %v2638_v12 = vld [vmem:[#allocation5 + $0x1ec] ss:$16 sps:$4 sm:$0xff]   ;;  %v97_v13 = vpack.c.bf16 %v90_v10, %v83_v9  ;;  %v2633_v14 = vld [vmem:[#allocation5 + $0x200] ss:$16 sps:$4 sm:$0xff]  }
  0x64   :  { %v2636_v15 = vld [vmem:[#allocation5 + $0x1e8] ss:$16 sps:$4 sm:$0xff]   ;;  %v2641_v16 = vld [vmem:[#allocation5 + $0x224] ss:$16 sps:$4 sm:$0xff]   ;;  %v2644_v17 = vld [vmem:[#allocation5 + $0x20c] ss:$16 sps:$4 sm:$0xff]  }
  0x65   :  { %1319 = vmatpush1.bf16.msra.mxu0 %v2578_v31  ;;  %v2639_v18 = vld [vmem:[#allocation5 + $0x220] ss:$16 sps:$4 sm:$0xff]   ;;  %v2642_v19 = vld [vmem:[#allocation5 + $0x208] ss:$16 sps:$4 sm:$0xff]   ;;  %v2647_v20 = vld [vmem:[#allocation5 + $0x244] ss:$16 sps:$4 sm:$0xff]  }
  0x66   :  { %1489 = vmatpush1.bf16.msra.mxu1 %v2575_v30  ;;  %1320 = vmatprep.subr.bf16.mxu0 %v2579_v32  ;;  %v2650_v21 = vld [vmem:[#allocation5 + $0x22c] ss:$16 sps:$4 sm:$0xff]   ;;  %v2645_v22 = vld [vmem:[#allocation5 + $0x240] ss:$16 sps:$4 sm:$0xff]   ;;  %v2648_v23 = vld [vmem:[#allocation5 + $0x228] ss:$16 sps:$4 sm:$0xff]  }
  0x67   :  { %1490 = vmatprep.subr.bf16.mxu1 %v2583_v33  ;;  %v2653_v24 = vld [vmem:[#allocation5 + $0x264] ss:$16 sps:$4 sm:$0xff]   ;;  %v2656_v25 = vld [vmem:[#allocation5 + $0x24c] ss:$16 sps:$4 sm:$0xff]   ;;  %v2651_v26 = vld [vmem:[#allocation5 + $0x260] ss:$16 sps:$4 sm:$0xff]  }
  0x68   :  { %v2654_v27 = vld [vmem:[#allocation5 + $0x248] ss:$16 sps:$4 sm:$0xff]   ;;  %v2659_v28 = vld [vmem:[#allocation5 + $0x284] ss:$16 sps:$4 sm:$0xff]   ;;  %v2662_v29 = vld [vmem:[#allocation5 + $0x26c] ss:$16 sps:$4 sm:$0xff]  }
  0x69   :  { %1321 = vmatpush1.bf16.msra.mxu0 %v2584_v35  ;;  %v2657_v30 = vld [vmem:[#allocation5 + $0x280] ss:$16 sps:$4 sm:$0xff]   ;;  %v2660_v31 = vld [vmem:[#allocation5 + $0x268] ss:$16 sps:$4 sm:$0xff]   ;;  %v2665_v32 = vld [vmem:[#allocation5 + $0x2a4] ss:$16 sps:$4 sm:$0xff]  }
  0x6a   :  { %1491 = vmatpush1.bf16.msra.mxu1 %v2581_v34  ;;  %1322 = vmatprep.subr.bf16.mxu0 %v2585_v36  ;;  %v2668_v33 = vld [vmem:[#allocation5 + $0x28c] ss:$16 sps:$4 sm:$0xff]   ;;  %v2663_v34 = vld [vmem:[#allocation5 + $0x2a0] ss:$16 sps:$4 sm:$0xff]   ;;  %v2666_v35 = vld [vmem:[#allocation5 + $0x288] ss:$16 sps:$4 sm:$0xff]  }
  0x6b   :  { %1492 = vmatprep.subr.bf16.mxu1 %v2589_v37  ;;  %v2671_v36 = vld [vmem:[#allocation5 + $0x2c4] ss:$16 sps:$4 sm:$0xff]   ;;  %v2674_v37 = vld [vmem:[#allocation5 + $0x2ac] ss:$16 sps:$4 sm:$0xff]   ;;  %v2687_v53 = vld [vmem:[#allocation5 + $0x320] ss:$16 sps:$4 sm:$0xff]  }
  0x6c   :  { %v2692_v52 = vld [vmem:[#allocation5 + $0x30c] ss:$16 sps:$4 sm:$0xff]   ;;  %v2695_v55 = vld [vmem:[#allocation5 + $0x344] ss:$16 sps:$4 sm:$0xff]  }
  0x6d   :  { %1323 = vmatpush1.bf16.msra.mxu0 %v2590_v39  ;;  %v2672_v39 = vld [vmem:[#allocation5 + $0x2a8] ss:$16 sps:$4 sm:$0xff]   ;;  %v2719_v9 = vld [vmem:[#allocation5 + $0x3c4] ss:$16 sps:$4 sm:$0xff]   ;;  %v2722_v10 = vld [vmem:[#allocation5 + $0x3ac] ss:$16 sps:$4 sm:$0xff]  }
  0x6e   :  { %1493 = vmatpush1.bf16.msra.mxu1 %v2587_v38  ;;  %1324 = vmatprep.subr.bf16.mxu0 %v2591_v40  ;;  %v2669_v38 = vld [vmem:[#allocation5 + $0x2c0] ss:$16 sps:$4 sm:$0xff]   ;;  %v86_v40 = vld [vmem:[#allocation2 + $0x18] sm:$0xff] }
  0x6f   :  { %1494 = vmatprep.subr.bf16.mxu1 %v2595_v41  ;;  %v93_v41 = vld [vmem:[#allocation2 + $0x50] sm:$0xff] }
  0x71   :  { %1325 = vmatpush1.bf16.msra.mxu0 %v2596_v43  ;;  %v100_v43 = vpack.c.bf16 %v93_v41, %v86_v40  ;;  %v2758_v40 = vld [vmem:[#allocation5 + $0x46c] ss:$16 sps:$4 sm:$0xff]   ;;  %v2753_v41 = vld [vmem:[#allocation5 + $0x480] ss:$16 sps:$4 sm:$0xff]  }
  0x72   :  { %1495 = vmatpush1.bf16.msra.mxu1 %v2593_v42  ;;  %1326 = vmatprep.subr.bf16.mxu0 %v2597_v44  ;;  %v2677_v42 = vld [vmem:[#allocation5 + $0x2e4] ss:$16 sps:$4 sm:$0xff]   ;;  %v2680_v44 = vld [vmem:[#allocation5 + $0x2cc] ss:$16 sps:$4 sm:$0xff]  }
  0x73   :  { %1496 = vmatprep.subr.bf16.mxu1 %v2601_v45  ;;  %v2675_v45 = vld [vmem:[#allocation5 + $0x2e0] ss:$16 sps:$4 sm:$0xff]  }
  0x75   :  { %1327 = vmatpush1.bf16.msra.mxu0 %v2602_v47  ;;  %v2683_v47 = vld [vmem:[#allocation5 + $0x304] ss:$16 sps:$4 sm:$0xff]  }
  0x76   :  { %1497 = vmatpush1.bf16.msra.mxu1 %v2599_v46  ;;  %1328 = vmatprep.subr.bf16.mxu0 %v2603_v48  ;;  %v2678_v46 = vld [vmem:[#allocation5 + $0x2c8] ss:$16 sps:$4 sm:$0xff]   ;;  %v2686_v48 = vld [vmem:[#allocation5 + $0x2ec] ss:$16 sps:$4 sm:$0xff]  }
  0x77   :  { %1498 = vmatprep.subr.bf16.mxu1 %v2607_v49  ;;  %v2681_v49 = vld [vmem:[#allocation5 + $0x300] ss:$16 sps:$4 sm:$0xff]  }
  0x79   :  { %1329 = vmatpush1.bf16.msra.mxu0 %v2608_v51  ;;  %v2689_v51 = vld [vmem:[#allocation5 + $0x324] ss:$16 sps:$4 sm:$0xff]  }
  0x7a   :  { %1499 = vmatpush1.bf16.msra.mxu1 %v2605_v50  ;;  %1330 = vmatprep.subr.bf16.mxu0 %v2609_v54  ;;  %v2684_v50 = vld [vmem:[#allocation5 + $0x2e8] ss:$16 sps:$4 sm:$0xff]  }
  0x7b   :  { %1500 = vmatprep.subr.bf16.mxu1 %v2613_v56  ;;  %v2690_v54 = vld [vmem:[#allocation5 + $0x308] ss:$16 sps:$4 sm:$0xff]   ;;  %v2698_v56 = vld [vmem:[#allocation5 + $0x32c] ss:$16 sps:$4 sm:$0xff]  }
  0x7d   :  { %1331 = vmatpush1.bf16.msra.mxu0 %v2614_v58  ;;  %v2696_v58 = vld [vmem:[#allocation5 + $0x328] ss:$16 sps:$4 sm:$0xff]  }
  0x7e   :  { %1501 = vmatpush1.bf16.msra.mxu1 %v2611_v57  ;;  %1332 = vmatprep.subr.bf16.mxu0 %v2615_v59  ;;  %v2693_v57 = vld [vmem:[#allocation5 + $0x340] ss:$16 sps:$4 sm:$0xff]   ;;  %v2701_v59 = vld [vmem:[#allocation5 + $0x364] ss:$16 sps:$4 sm:$0xff]  }
  0x7f   :  { %1502 = vmatprep.subr.bf16.mxu1 %v2619_v60  ;;  %v2704_v60 = vld [vmem:[#allocation5 + $0x34c] ss:$16 sps:$4 sm:$0xff]  }
  0x81   :  { %1333 = vmatpush1.bf16.msra.mxu0 %v2620_v62  ;;  %v2702_v62 = vld [vmem:[#allocation5 + $0x348] ss:$16 sps:$4 sm:$0xff]  }
  0x82   :  { %1503 = vmatpush1.bf16.msra.mxu1 %v2617_v61  ;;  %1334 = vmatprep.subr.bf16.mxu0 %v2621_v63  ;;  %v2699_v61 = vld [vmem:[#allocation5 + $0x360] ss:$16 sps:$4 sm:$0xff]   ;;  %v2707_v63 = vld [vmem:[#allocation5 + $0x384] ss:$16 sps:$4 sm:$0xff]  }
  0x83   :  { %1504 = vmatprep.subr.bf16.mxu1 %v2625_v1  ;;  %v2710_v1 = vld [vmem:[#allocation5 + $0x36c] ss:$16 sps:$4 sm:$0xff]  }
  0x85   :  { %1335 = vmatpush1.bf16.msra.mxu0 %v2626_v3  ;;  %v2708_v3 = vld [vmem:[#allocation5 + $0x368] ss:$16 sps:$4 sm:$0xff]  }
  0x86   :  { %1505 = vmatpush1.bf16.msra.mxu1 %v2623_v2  ;;  %1336 = vmatprep.subr.bf16.mxu0 %v2627_v4  ;;  %v2705_v2 = vld [vmem:[#allocation5 + $0x380] ss:$16 sps:$4 sm:$0xff]   ;;  %v2713_v4 = vld [vmem:[#allocation5 + $0x3a4] ss:$16 sps:$4 sm:$0xff]  }
  0x87   :  { %1506 = vmatprep.subr.bf16.mxu1 %v2631_v5  ;;  %v2716_v5 = vld [vmem:[#allocation5 + $0x38c] ss:$16 sps:$4 sm:$0xff]  }
  0x89   :  { %1337 = vmatpush1.bf16.msra.mxu0 %v2632_v7  ;;  %v2714_v7 = vld [vmem:[#allocation5 + $0x388] ss:$16 sps:$4 sm:$0xff]  }
  0x8a   :  { %1507 = vmatpush1.bf16.msra.mxu1 %v2629_v6  ;;  %1349 = vmatprep.subr.bf16.mxu0 %v2635_v11  ;;  %v2711_v6 = vld [vmem:[#allocation5 + $0x3a0] ss:$16 sps:$4 sm:$0xff]  }
  0x8b   :  { %1508 = vmatprep.subr.bf16.mxu1 %v2638_v12  ;;  %v2717_v11 = vld [vmem:[#allocation5 + $0x3c0] ss:$16 sps:$4 sm:$0xff]   ;;  %v2720_v12 = vld [vmem:[#allocation5 + $0x3a8] ss:$16 sps:$4 sm:$0xff]  }
  0x8c   :  { %1339 = vmatmul.mubr.bf16.vlgmr.msra.gmra.mrb[0].mxu0 %v97_v13 }
  0x8d   :  { %1350 = vmatpush1.bf16.msra.mxu0 %v2633_v14  ;;  %1381 = vmatprep.mubr.bf16.mxu0 %v100_v43  ;;  %v2728_v14 = vld [vmem:[#allocation5 + $0x3cc] ss:$16 sps:$4 sm:$0xff]  }
  0x8e   :  { %1509 = vmatpush1.bf16.msra.mxu1 %v2636_v15  ;;  %1351 = vmatprep.subr.bf16.mxu0 %v2641_v16  ;;  %v2723_v15 = vld [vmem:[#allocation5 + $0x3e0] ss:$16 sps:$4 sm:$0xff]   ;;  %v2726_v16 = vld [vmem:[#allocation5 + $0x3c8] ss:$16 sps:$4 sm:$0xff]  }
  0x8f   :  { %1521 = vmatprep.subr.bf16.mxu1 %v2644_v17  ;;  %v85_v17 = vld [vmem:[#allocation2 + $0x10] sm:$0xff] }
  0x91   :  { %1511 = vmatmul.mubr.bf16.vlgmr.msra.gmra.mrb[4].mxu1 %v97_v13  ;;  %1352 = vmatpush1.bf16.msra.mxu0 %v2639_v18  ;;  %v2725_v13 = vld [vmem:[#allocation5 + $0x3e4] ss:$16 sps:$4 sm:$0xff]   ;;  %v92_v18 = vld [vmem:[#allocation2 + $0x48] sm:$0xff] }
  0x92   :  { %1522 = vmatpush1.bf16.msra.mxu1 %v2642_v19  ;;  %1353 = vmatprep.subr.bf16.mxu0 %v2647_v20  ;;  %v2731_v19 = vld [vmem:[#allocation5 + $0x404] ss:$16 sps:$4 sm:$0xff]   ;;  %v2734_v20 = vld [vmem:[#allocation5 + $0x3ec] ss:$16 sps:$4 sm:$0xff]  }
  0x93   :  { %1523 = vmatprep.subr.bf16.mxu1 %v2650_v21  ;;  %1553 = vmatprep.mubr.bf16.mxu1 %v100_v43  ;;  %v99_v21 = vpack.c.bf16 %v92_v18, %v85_v17  ;;  %v2761_v43 = vld [vmem:[#allocation5 + $0x4a4] ss:$16 sps:$4 sm:$0xff]   ;;  %v2818_v18 = vld [vmem:[#allocation5 + $0x5ac] ss:$16 sps:$4 sm:$0xff]  }
  0x94   :  { %v2815_v17 = vld [vmem:[#allocation5 + $0x5c4] ss:$16 sps:$4 sm:$0xff]  }
  0x95   :  { %1354 = vmatpush1.bf16.msra.mxu0 %v2645_v22  ;;  %v2729_v22 = vld [vmem:[#allocation5 + $0x400] ss:$16 sps:$4 sm:$0xff]  }
  0x96   :  { %1524 = vmatpush1.bf16.msra.mxu1 %v2648_v23  ;;  %1355 = vmatprep.subr.bf16.mxu0 %v2653_v24  ;;  %v2732_v23 = vld [vmem:[#allocation5 + $0x3e8] ss:$16 sps:$4 sm:$0xff]   ;;  %v2737_v24 = vld [vmem:[#allocation5 + $0x424] ss:$16 sps:$4 sm:$0xff]  }
  0x97   :  { %1525 = vmatprep.subr.bf16.mxu1 %v2656_v25  ;;  %v2740_v25 = vld [vmem:[#allocation5 + $0x40c] ss:$16 sps:$4 sm:$0xff]  }
  0x99   :  { %1356 = vmatpush1.bf16.msra.mxu0 %v2651_v26  ;;  %v88_v26 = vld [vmem:[#allocation2 + $0x28] sm:$0xff] }
  0x9a   :  { %1526 = vmatpush1.bf16.msra.mxu1 %v2654_v27  ;;  %1357 = vmatprep.subr.bf16.mxu0 %v2659_v28  ;;  %v95_v27 = vld [vmem:[#allocation2 + $0x60] sm:$0xff] }
  0x9b   :  { %1527 = vmatprep.subr.bf16.mxu1 %v2662_v29  ;;  %v2735_v28 = vld [vmem:[#allocation5 + $0x420] ss:$16 sps:$4 sm:$0xff]   ;;  %v2738_v29 = vld [vmem:[#allocation5 + $0x408] ss:$16 sps:$4 sm:$0xff]  }
  0x9d   :  { %1358 = vmatpush1.bf16.msra.mxu0 %v2657_v30  ;;  %v102_v30 = vpack.c.bf16 %v95_v27, %v88_v26  ;;  %v94_v26 = vld [vmem:[#allocation2 + $0x58] sm:$0xff] }
  0x9e   :  { %1528 = vmatpush1.bf16.msra.mxu1 %v2660_v31  ;;  %1359 = vmatprep.subr.bf16.mxu0 %v2665_v32  ;;  %v2743_v31 = vld [vmem:[#allocation5 + $0x444] ss:$16 sps:$4 sm:$0xff]   ;;  %v2746_v32 = vld [vmem:[#allocation5 + $0x42c] ss:$16 sps:$4 sm:$0xff]  }
  0x9f   :  { %1529 = vmatprep.subr.bf16.mxu1 %v2668_v33  ;;  %v2741_v33 = vld [vmem:[#allocation5 + $0x440] ss:$16 sps:$4 sm:$0xff]   ;;  %v2827_v27 = vld [vmem:[#allocation5 + $0x5ec] ss:$16 sps:$4 sm:$0xff]  }
  0xa1   :  { %1360 = vmatpush1.bf16.msra.mxu0 %v2663_v34  ;;  %v2744_v34 = vld [vmem:[#allocation5 + $0x428] ss:$16 sps:$4 sm:$0xff]  }
  0xa2   :  { %1530 = vmatpush1.bf16.msra.mxu1 %v2666_v35  ;;  %1361 = vmatprep.subr.bf16.mxu0 %v2671_v36  ;;  %v2749_v35 = vld [vmem:[#allocation5 + $0x464] ss:$16 sps:$4 sm:$0xff]   ;;  %v2752_v36 = vld [vmem:[#allocation5 + $0x44c] ss:$16 sps:$4 sm:$0xff]  }
  0xa3   :  { %1531 = vmatprep.subr.bf16.mxu1 %v2674_v37  ;;  %v2747_v37 = vld [vmem:[#allocation5 + $0x460] ss:$16 sps:$4 sm:$0xff]  }
  0xa5   :  { %1362 = vmatpush1.bf16.msra.mxu0 %v2669_v38  ;;  %v2750_v38 = vld [vmem:[#allocation5 + $0x448] ss:$16 sps:$4 sm:$0xff]  }
  0xa6   :  { %1532 = vmatpush1.bf16.msra.mxu1 %v2672_v39  ;;  %1363 = vmatprep.subr.bf16.mxu0 %v2677_v42  ;;  %v2755_v39 = vld [vmem:[#allocation5 + $0x484] ss:$16 sps:$4 sm:$0xff]   ;;  %v2756_v42 = vld [vmem:[#allocation5 + $0x468] ss:$16 sps:$4 sm:$0xff]  }
  0xa7   :  { %1533 = vmatprep.subr.bf16.mxu1 %v2680_v44  ;;  %v2764_v44 = vld [vmem:[#allocation5 + $0x48c] ss:$16 sps:$4 sm:$0xff]  }
  0xa9   :  { %1364 = vmatpush1.bf16.msra.mxu0 %v2675_v45  ;;  %v2759_v45 = vld [vmem:[#allocation5 + $0x4a0] ss:$16 sps:$4 sm:$0xff]  }
  0xaa   :  { %1534 = vmatpush1.bf16.msra.mxu1 %v2678_v46  ;;  %1365 = vmatprep.subr.bf16.mxu0 %v2683_v47  ;;  %v2762_v46 = vld [vmem:[#allocation5 + $0x488] ss:$16 sps:$4 sm:$0xff]   ;;  %v2767_v47 = vld [vmem:[#allocation5 + $0x4c4] ss:$16 sps:$4 sm:$0xff]  }
  0xab   :  { %1535 = vmatprep.subr.bf16.mxu1 %v2686_v48  ;;  %v2770_v48 = vld [vmem:[#allocation5 + $0x4ac] ss:$16 sps:$4 sm:$0xff]  }
  0xad   :  { %1366 = vmatpush1.bf16.msra.mxu0 %v2681_v49  ;;  %v2765_v49 = vld [vmem:[#allocation5 + $0x4c0] ss:$16 sps:$4 sm:$0xff]  }
  0xae   :  { %1536 = vmatpush1.bf16.msra.mxu1 %v2684_v50  ;;  %1367 = vmatprep.subr.bf16.mxu0 %v2689_v51  ;;  %v2768_v50 = vld [vmem:[#allocation5 + $0x4a8] ss:$16 sps:$4 sm:$0xff]   ;;  %v2773_v51 = vld [vmem:[#allocation5 + $0x4e4] ss:$16 sps:$4 sm:$0xff]  }
  0xaf   :  { %1537 = vmatprep.subr.bf16.mxu1 %v2692_v52  ;;  %v2776_v52 = vld [vmem:[#allocation5 + $0x4cc] ss:$16 sps:$4 sm:$0xff]  }
  0xb1   :  { %1368 = vmatpush1.bf16.msra.mxu0 %v2687_v53  ;;  %v2771_v53 = vld [vmem:[#allocation5 + $0x4e0] ss:$16 sps:$4 sm:$0xff]  }
  0xb2   :  { %1538 = vmatpush1.bf16.msra.mxu1 %v2690_v54  ;;  %1369 = vmatprep.subr.bf16.mxu0 %v2695_v55  ;;  %v2774_v54 = vld [vmem:[#allocation5 + $0x4c8] ss:$16 sps:$4 sm:$0xff]   ;;  %v2779_v55 = vld [vmem:[#allocation5 + $0x504] ss:$16 sps:$4 sm:$0xff]  }
  0xb3   :  { %1539 = vmatprep.subr.bf16.mxu1 %v2698_v56  ;;  %v2782_v56 = vld [vmem:[#allocation5 + $0x4ec] ss:$16 sps:$4 sm:$0xff]  }
  0xb5   :  { %1370 = vmatpush1.bf16.msra.mxu0 %v2693_v57  ;;  %v2777_v57 = vld [vmem:[#allocation5 + $0x500] ss:$16 sps:$4 sm:$0xff]  }
  0xb6   :  { %1540 = vmatpush1.bf16.msra.mxu1 %v2696_v58  ;;  %1371 = vmatprep.subr.bf16.mxu0 %v2701_v59  ;;  %v2780_v58 = vld [vmem:[#allocation5 + $0x4e8] ss:$16 sps:$4 sm:$0xff]   ;;  %v2785_v59 = vld [vmem:[#allocation5 + $0x524] ss:$16 sps:$4 sm:$0xff]  }
  0xb7   :  { %1541 = vmatprep.subr.bf16.mxu1 %v2704_v60  ;;  %v2788_v60 = vld [vmem:[#allocation5 + $0x50c] ss:$16 sps:$4 sm:$0xff]  }
  0xb9   :  { %1372 = vmatpush1.bf16.msra.mxu0 %v2699_v61  ;;  %v2783_v61 = vld [vmem:[#allocation5 + $0x520] ss:$16 sps:$4 sm:$0xff]  }
  0xba   :  { %1542 = vmatpush1.bf16.msra.mxu1 %v2702_v62  ;;  %1373 = vmatprep.subr.bf16.mxu0 %v2707_v63  ;;  %v2786_v62 = vld [vmem:[#allocation5 + $0x508] ss:$16 sps:$4 sm:$0xff]   ;;  %v2791_v63 = vld [vmem:[#allocation5 + $0x544] ss:$16 sps:$4 sm:$0xff]  }
  0xbb   :  { %1543 = vmatprep.subr.bf16.mxu1 %v2710_v1  ;;  %v2794_v1 = vld [vmem:[#allocation5 + $0x52c] ss:$16 sps:$4 sm:$0xff]  }
  0xbd   :  { %1374 = vmatpush1.bf16.msra.mxu0 %v2705_v2  ;;  %v2789_v2 = vld [vmem:[#allocation5 + $0x540] ss:$16 sps:$4 sm:$0xff]  }
  0xbe   :  { %1544 = vmatpush1.bf16.msra.mxu1 %v2708_v3  ;;  %1375 = vmatprep.subr.bf16.mxu0 %v2713_v4  ;;  %v2792_v3 = vld [vmem:[#allocation5 + $0x528] ss:$16 sps:$4 sm:$0xff]   ;;  %v2797_v4 = vld [vmem:[#allocation5 + $0x564] ss:$16 sps:$4 sm:$0xff]  }
  0xbf   :  { %1545 = vmatprep.subr.bf16.mxu1 %v2716_v5  ;;  %v2800_v5 = vld [vmem:[#allocation5 + $0x54c] ss:$16 sps:$4 sm:$0xff]  }
  0xc1   :  { %1376 = vmatpush1.bf16.msra.mxu0 %v2711_v6  ;;  %v2795_v6 = vld [vmem:[#allocation5 + $0x560] ss:$16 sps:$4 sm:$0xff]  }
  0xc2   :  { %1546 = vmatpush1.bf16.msra.mxu1 %v2714_v7  ;;  %1377 = vmatprep.subr.bf16.mxu0 %v2719_v9  ;;  %v2798_v7 = vld [vmem:[#allocation5 + $0x548] ss:$16 sps:$4 sm:$0xff]   ;;  %v2803_v9 = vld [vmem:[#allocation5 + $0x584] ss:$16 sps:$4 sm:$0xff]  }
  0xc3   :  { %1547 = vmatprep.subr.bf16.mxu1 %v2722_v10  ;;  %v2806_v10 = vld [vmem:[#allocation5 + $0x56c] ss:$16 sps:$4 sm:$0xff]  }
  0xc5   :  { %1378 = vmatpush1.bf16.msra.mxu0 %v2717_v11  ;;  %v2801_v11 = vld [vmem:[#allocation5 + $0x580] ss:$16 sps:$4 sm:$0xff]  }
  0xc6   :  { %1548 = vmatpush1.bf16.msra.mxu1 %v2720_v12  ;;  %1379 = vmatprep.subr.bf16.mxu0 %v2725_v13  ;;  %v2804_v12 = vld [vmem:[#allocation5 + $0x568] ss:$16 sps:$4 sm:$0xff]   ;;  %v2809_v13 = vld [vmem:[#allocation5 + $0x5a4] ss:$16 sps:$4 sm:$0xff]  }
  0xc7   :  { %1549 = vmatprep.subr.bf16.mxu1 %v2728_v14  ;;  %v2812_v14 = vld [vmem:[#allocation5 + $0x58c] ss:$16 sps:$4 sm:$0xff]  }
  0xc9   :  { %1380 = vmatpush1.bf16.msra.mxu0 %v2723_v15  ;;  %v2807_v15 = vld [vmem:[#allocation5 + $0x5a0] ss:$16 sps:$4 sm:$0xff]  }
  0xca   :  { %1550 = vmatpush1.bf16.msra.mxu1 %v2726_v16  ;;  %1392 = vmatprep.subr.bf16.mxu0 %v2731_v19  ;;  %v2810_v16 = vld [vmem:[#allocation5 + $0x588] ss:$16 sps:$4 sm:$0xff]   ;;  %v2813_v19 = vld [vmem:[#allocation5 + $0x5c0] ss:$16 sps:$4 sm:$0xff]  }
  0xcb   :  { %1551 = vmatprep.subr.bf16.mxu1 %v2734_v20  ;;  %v2816_v20 = vld [vmem:[#allocation5 + $0x5a8] ss:$16 sps:$4 sm:$0xff]  }
  0xcc   :  { %1382 = vmatmul.mubr.bf16.vlgmr.msra.gmra.mrb[0].mxu0 %v99_v21 }
  0xcd   :  { %1393 = vmatpush1.bf16.msra.mxu0 %v2729_v22  ;;  %1424 = vmatprep.mubr.bf16.mxu0 %v102_v30  ;;  %v2824_v22 = vld [vmem:[#allocation5 + $0x5cc] ss:$16 sps:$4 sm:$0xff]  }
  0xce   :  { %1552 = vmatpush1.bf16.msra.mxu1 %v2732_v23  ;;  %1394 = vmatprep.subr.bf16.mxu0 %v2737_v24  ;;  %v2819_v23 = vld [vmem:[#allocation5 + $0x5e0] ss:$16 sps:$4 sm:$0xff]   ;;  %v2822_v24 = vld [vmem:[#allocation5 + $0x5c8] ss:$16 sps:$4 sm:$0xff]  }
  0xcf   :  { %1564 = vmatprep.subr.bf16.mxu1 %v2740_v25  ;;  %v87_v25 = vld [vmem:[#allocation2 + $0x20] sm:$0xff] }
  0xd1   :  { %1554 = vmatmul.mubr.bf16.vlgmr.msra.gmra.mrb[4].mxu1 %v99_v21  ;;  %1395 = vmatpush1.bf16.msra.mxu0 %v2735_v28  ;;  %v2821_v21 = vld [vmem:[#allocation5 + $0x5e4] ss:$16 sps:$4 sm:$0xff]  }
  0xd2   :  { %1565 = vmatpush1.bf16.msra.mxu1 %v2738_v29  ;;  %1396 = vmatprep.subr.bf16.mxu0 %v2743_v31  ;;  %v2831_v28 = vld [vmem:[#allocation7 + $0x40] sm:$0xff]   ;;  %v101_v29 = vpack.c.bf16 %v94_v26, %v87_v25 }
  0xd3   :  { %1566 = vmatprep.subr.bf16.mxu1 %v2746_v32  ;;  %1596 = vmatprep.mubr.bf16.mxu1 %v102_v30  ;;  %v2825_v30 = vld [vmem:[#allocation5 + $0x5e8] ss:$16 sps:$4 sm:$0xff]   ;;  %v2832_v31 = vld [vmem:[#allocation7] sm:$0xff]   ;;  %v2830_v32 = vld [vmem:[#allocation5 + $0x60c] ss:$16 sps:$4 sm:$0xff]  }
  0xd5   :  { %1397 = vmatpush1.bf16.msra.mxu0 %v2741_v33  ;;  %v2833_v33 = vld [vmem:[#allocation7 + $0x48] sm:$0xff]  }
  0xd6   :  { %1567 = vmatpush1.bf16.msra.mxu1 %v2744_v34  ;;  %1398 = vmatprep.subr.bf16.mxu0 %v2749_v35  ;;  %v2828_v34 = vld [vmem:[#allocation5 + $0x608] ss:$16 sps:$4 sm:$0xff]  }
  0xd7   :  { %1568 = vmatprep.subr.bf16.mxu1 %v2752_v36  ;;  %v2834_v35 = vld [vmem:[#allocation7 + $0x8] sm:$0xff]   ;;  %v2839_v36 = vld [vmem:[#allocation7 + $0xc0] sm:$0xff]  }
  0xd9   :  { %1399 = vmatpush1.bf16.msra.mxu0 %v2747_v37  ;;  %v2835_v37 = vld [vmem:[#allocation7 + $0x50] sm:$0xff]  }
  0xda   :  { %1569 = vmatpush1.bf16.msra.mxu1 %v2750_v38  ;;  %1400 = vmatprep.subr.bf16.mxu0 %v2755_v39  ;;  %v2836_v38 = vld [vmem:[#allocation7 + $0x10] sm:$0xff]   ;;  %v2837_v39 = vld [vmem:[#allocation7 + $0x58] sm:$0xff]  }
  0xdb   :  { %1570 = vmatprep.subr.bf16.mxu1 %v2758_v40  ;;  %v2838_v40 = vld [vmem:[#allocation7 + $0x18] sm:$0xff]  }
  0xdd   :  { %1401 = vmatpush1.bf16.msra.mxu0 %v2753_v41  ;;  %v2841_v41 = vld [vmem:[#allocation7 + $0x60] sm:$0xff]  }
  0xde   :  { %1571 = vmatpush1.bf16.msra.mxu1 %v2756_v42  ;;  %1402 = vmatprep.subr.bf16.mxu0 %v2761_v43  ;;  %v2840_v42 = vld [vmem:[#allocation7 + $0x80] sm:$0xff]  }
  0xdf   :  { %1572 = vmatprep.subr.bf16.mxu1 %v2764_v44  ;;  %v2842_v43 = vld [vmem:[#allocation7 + $0x20] sm:$0xff]   ;;  %v2843_v44 = vld [vmem:[#allocation7 + $0xc8] sm:$0xff]  }
  0xe1   :  { %1403 = vmatpush1.bf16.msra.mxu0 %v2759_v45 }
  0xe2   :  { %1573 = vmatpush1.bf16.msra.mxu1 %v2762_v46  ;;  %1404 = vmatprep.subr.bf16.mxu0 %v2767_v47 }
  0xe3   :  { %1574 = vmatprep.subr.bf16.mxu1 %v2770_v48  ;;  %v2844_v48 = vld [vmem:[#allocation7 + $0x88] sm:$0xff]  }
  0xe5   :  { %1405 = vmatpush1.bf16.msra.mxu0 %v2765_v49  ;;  %v2845_v49 = vld [vmem:[#allocation7 + $0x68] sm:$0xff]  }
  0xe6   :  { %1575 = vmatpush1.bf16.msra.mxu1 %v2768_v50  ;;  %1406 = vmatprep.subr.bf16.mxu0 %v2773_v51  ;;  %v2846_v50 = vld [vmem:[#allocation7 + $0x28] sm:$0xff]   ;;  %v2847_v51 = vld [vmem:[#allocation7 + $0xd0] sm:$0xff]  }
  0xe7   :  { %1576 = vmatprep.subr.bf16.mxu1 %v2776_v52  ;;  %v2848_v52 = vld [vmem:[#allocation7 + $0x90] sm:$0xff]  }
  0xe9   :  { %1407 = vmatpush1.bf16.msra.mxu0 %v2771_v53  ;;  %v2849_v53 = vld [vmem:[#allocation7 + $0x70] sm:$0xff]  }
  0xea   :  { %1577 = vmatpush1.bf16.msra.mxu1 %v2774_v54  ;;  %1408 = vmatprep.subr.bf16.mxu0 %v2779_v55  ;;  %v2850_v54 = vld [vmem:[#allocation7 + $0x30] sm:$0xff]   ;;  %v2852_v55 = vld [vmem:[#allocation7 + $0x98] sm:$0xff]  }
  0xeb   :  { %1578 = vmatprep.subr.bf16.mxu1 %v2782_v56  ;;  %v2853_v56 = vld [vmem:[#allocation7 + $0x78] sm:$0xff]  }
  0xed   :  { %1409 = vmatpush1.bf16.msra.mxu0 %v2777_v57  ;;  %v2854_v57 = vld [vmem:[#allocation7 + $0x38] sm:$0xff]  }
  0xee   :  { %1579 = vmatpush1.bf16.msra.mxu1 %v2780_v58  ;;  %1410 = vmatprep.subr.bf16.mxu0 %v2785_v59  ;;  %v2855_v58 = vld [vmem:[#allocation7 + $0xe0] sm:$0xff]  }
  0xef   :  { %1580 = vmatprep.subr.bf16.mxu1 %v2788_v60  ;;  %v2856_v59 = vld [vmem:[#allocation7 + $0xa0] sm:$0xff]   ;;  %v2857_v60 = vld [vmem:[#allocation7 + $0xe8] sm:$0xff]  }
  0xf1   :  { %1411 = vmatpush1.bf16.msra.mxu0 %v2783_v61  ;;  %v2858_v61 = vld [vmem:[#allocation7 + $0xa8] sm:$0xff]  }
  0xf2   :  { %1581 = vmatpush1.bf16.msra.mxu1 %v2786_v62  ;;  %1412 = vmatprep.subr.bf16.mxu0 %v2791_v63  ;;  %v2859_v62 = vld [vmem:[#allocation7 + $0xf0] sm:$0xff]  }
  0xf3   :  { %1582 = vmatprep.subr.bf16.mxu1 %v2794_v1  ;;  %v2860_v63 = vld [vmem:[#allocation7 + $0xb0] sm:$0xff]   ;;  %v2861_v1 = vld [vmem:[#allocation7 + $0xf8] sm:$0xff]  }
  0xf5   :  { %1413 = vmatpush1.bf16.msra.mxu0 %v2789_v2  ;;  %v2862_v2 = vld [vmem:[#allocation7 + $0xb8] sm:$0xff]  }
  0xf6   :  { %1583 = vmatpush1.bf16.msra.mxu1 %v2792_v3  ;;  %1414 = vmatprep.subr.bf16.mxu0 %v2797_v4  ;;  %v3008_v3 = vmov 0.0   ;;  %v302_v4 = vlaneseq }
  0xf7   :  { %1584 = vmatprep.subr.bf16.mxu1 %v2800_v5 }
  0xf8   :  { %v303_v5 = vshrl.u32 %v302_v4, 7 }
  0xf9   :  { %1415 = vmatpush1.bf16.msra.mxu0 %v2795_v6 }
  0xfa   :  { %1585 = vmatpush1.bf16.msra.mxu1 %v2798_v7  ;;  %1416 = vmatprep.subr.bf16.mxu0 %v2803_v9  ;;  %v304_v6 = vsub.s32 0, %v303_v5  ;;  %v300_v7 = vld [vmem:[%s3148_s2] sm:$0xf]  ;;  %v308_v9 = vsub.s32 1, %v303_v5 }
  0xfb   :  { %1586 = vmatprep.subr.bf16.mxu1 %v2806_v10 }
  0xfc   :  { %v305_v10 = vrot.slane %v300_v7, %v304_v6 }
  0xfd   :  { %1417 = vmatpush1.bf16.msra.mxu0 %v2801_v11  ;;  %v309_v11 = vrot.slane %v300_v7, %v308_v9 }
  0xfe   :  { %1587 = vmatpush1.bf16.msra.mxu1 %v2804_v12  ;;  %1418 = vmatprep.subr.bf16.mxu0 %v2809_v13 }
  0xff   :  { %1588 = vmatprep.subr.bf16.mxu1 %v2812_v14 }
 0x101   :  { %1419 = vmatpush1.bf16.msra.mxu0 %v2807_v15 }
 0x102   :  { %1589 = vmatpush1.bf16.msra.mxu1 %v2810_v16  ;;  %1420 = vmatprep.subr.bf16.mxu0 %v2815_v17 }
 0x103   :  { %1590 = vmatprep.subr.bf16.mxu1 %v2818_v18 }
 0x105   :  { %1421 = vmatpush1.bf16.msra.mxu0 %v2813_v19 }
 0x106   :  { %1591 = vmatpush1.bf16.msra.mxu1 %v2816_v20  ;;  %1422 = vmatprep.subr.bf16.mxu0 %v2821_v21 }
 0x107   :  { %1592 = vmatprep.subr.bf16.mxu1 %v2824_v22 }
 0x109   :  { %1423 = vmatpush1.bf16.msra.mxu0 %v2819_v23 }
 0x10a   :  { %1593 = vmatpush1.bf16.msra.mxu1 %v2822_v24  ;;  %2418 = vmatprep.subr.bf16.mxu0 %v2831_v28 }
 0x10b   :  { %1594 = vmatprep.subr.bf16.mxu1 %v2827_v27 }
 0x10c   :  { %1425 = vmatmul.mubr.bf16.vlgmr.msra.gmra.mrb[0].mxu0 %v101_v29 }
 0x10d   :  { %2419 = vmatpush3.bf16.msra.mxu0 %v2832_v31  ;;  %v316_v31 = vsub.s32 3, %v303_v5 }
 0x10e   :  { %1595 = vmatpush1.bf16.msra.mxu1 %v2825_v30  ;;  %2420 = vmatprep.subr.bf16.mxu0 %v2833_v33 }
 0x10f   :  { %1607 = vmatprep.subr.bf16.mxu1 %v2830_v32  ;;  %v2863_v32 = vld [vmem:[#allocation8] sm:$0xff]  }
 0x111   :  { %1597 = vmatmul.mubr.bf16.vlgmr.msra.gmra.mrb[4].mxu1 %v101_v29  ;;  %2421 = vmatpush3.bf16.msra.mxu0 %v2834_v35  ;;  %v312_v29 = vsub.s32 2, %v303_v5  ;;  %v2864_v35 = vld [vmem:[#allocation8 + $0x8] sm:$0xff]  }
 0x112   :  { %1608 = vmatpush1.bf16.msra.mxu1 %v2828_v34  ;;  %1639 = vmatprep.mubr.bf16.mxu1 %v3007_v0  ;;  %v317_v34 = vrot.slane %v300_v7, %v316_v31 }
 0x113   :  { %2440 = vmatprep.subr.bf16.mxu1 %v2839_v36  ;;  %2422 = vmatprep.subr.bf16.mxu0 %v2835_v37  ;;  %v313_v33 = vrot.slane %v300_v7, %v312_v29 }
 0x115   :  { %2423 = vmatpush3.bf16.msra.mxu0 %v2836_v38 }
 0x116   :  { %2424 = vmatprep.subr.bf16.mxu0 %v2837_v39 }
 0x119   :  { %2425 = vmatpush3.bf16.msra.mxu0 %v2838_v40 }
 0x11a   :  { %2426 = vmatprep.subr.bf16.mxu0 %v2841_v41 }
 0x11d   :  { %2366 = vmatmul.mubr.msk.bf16.vlgmr.msra.gmra.mrb[4].mxu1 %vm1302_vm0, %v3106_v8  ;;  %2427 = vmatpush3.bf16.msra.mxu0 %v2842_v43  ;;  %v2851_v8 = vld [vmem:[#allocation7 + $0xd8] sm:$0xff]  }
 0x11e   :  { %2441 = vmatpush3.bf16.msra.mxu1 %v2840_v42  ;;  %2428 = vmatprep.subr.bf16.mxu0 %v2845_v49  ;;  %v2865_v49 = vld [vmem:[#allocation8 + $0x10] sm:$0xff]  }
 0x11f   :  { %2442 = vmatprep.subr.bf16.mxu1 %v2843_v44 }
 0x121   :  { %2429 = vmatpush3.bf16.msra.mxu0 %v2846_v50  ;;  %v2866_v50 = vld [vmem:[#allocation8 + $0x18] sm:$0xff]  }
 0x122   :  { %2443 = vmatpush3.bf16.msra.mxu1 %v2844_v48  ;;  %2430 = vmatprep.subr.bf16.mxu0 %v2849_v53  ;;  %v2869_v53 = vld [vmem:[#allocation8 + $0x30] sm:$0xff]  }
 0x123   :  { %2444 = vmatprep.subr.bf16.mxu1 %v2847_v51  ;;  %v2867_v51 = vld [vmem:[#allocation8 + $0x20] sm:$0xff]  }
 0x124   :  { %v1469_v0 = vpop.f32.mrb[0].mxu1 }
 0x125   :  { %v1471_v45 = vpop.f32.mrb[1].mxu1  ;;  %2431 = vmatpush3.bf16.msra.mxu0 %v2850_v54  ;;  %v2870_v54 = vld [vmem:[#allocation8 + $0x38] sm:$0xff]  }
 0x126   :  { %v1473_v46 = vpop.f32.mrb[2].mxu1  ;;  %2445 = vmatpush3.bf16.msra.mxu1 %v2848_v52  ;;  %2432 = vmatprep.subr.bf16.mxu0 %v2853_v56  ;;  %v2868_v52 = vld [vmem:[#allocation8 + $0x28] sm:$0xff]  }
 0x127   :  { %v1475_v47 = vpop.f32.mrb[3].mxu1  ;;  %2446 = vmatprep.subr.bf16.mxu1 %v2851_v8 }
 0x129   :  { %2433 = vmatpush3.bf16.msra.mxu0 %v2854_v57 }
 0x12a   :  { %2447 = vmatpush3.bf16.msra.mxu1 %v2852_v55  ;;  %2471 = vmatprep.subr.bf16.mxu0 %v3008_v3 }
 0x12b   :  { %2448 = vmatprep.subr.bf16.mxu1 %v2855_v58 }
 0x12e   :  { %2449 = vmatpush3.bf16.msra.mxu1 %v2856_v59 }
 0x12f   :  { %2450 = vmatprep.subr.bf16.mxu1 %v2857_v60  ;;  %v2367_v60 = vld [vmem:[%s3150_s4] ss:$0 sm:$0xff]  ;;  %s3010_s4 = smov [#allocation10]  }
 0x132   :  { %2451 = vmatpush3.bf16.msra.mxu1 %v2858_v61 }
 0x133   :  { %2452 = vmatprep.subr.bf16.mxu1 %v2859_v62 }
 0x136   :  { %2453 = vmatpush3.bf16.msra.mxu1 %v2860_v63 }
 0x137   :  { %2454 = vmatprep.subr.bf16.mxu1 %v2861_v1 }
 0x13a   :  { %2455 = vmatpush3.bf16.msra.mxu1 %v2862_v2 }
 0x1df   :  { %v1426_v12 = vpop.f32.mrb[0].mxu0 }
 0x1e0   :  { %v2491_v13 = vadd.f32 %v1426_v12, %v305_v10  ;;  %v1428_v14 = vpop.f32.mrb[1].mxu0  ;;  %v2400_v12 = vld [vmem:[%s3152_s6] ss:$0 sm:$0xff]  ;;  %s2155_s6 = sshll.u32 %s3010_s4, 4  ;;  %s2156_s6 = int_to_ptr.vmem [resolvable:$true] %s2155_s6 }
 0x1e1   :  { %v2493_v15 = vadd.f32 %v1428_v14, %v309_v11  ;;  %v1430_v16 = vpop.f32.mrb[2].mxu0  ;;  %s2967_s9 = scalar_lea.vmem %s2156_s6, 128  ;;  %p2972_p5 = scmp.lt.s32.totalorder %s2156_s6, %s2156_s6 }
 0x1e2   :  { %v2492_v17 = vadd.f32 %v2491_v13, %v1469_v0  ;;  %v2495_v18 = vadd.f32 %v1430_v16, %v305_v10  ;;  %v1432_v19 = vpop.f32.mrb[3].mxu0  ;;  %p2968_p4 = scmp.ne.s32.totalorder %s2156_s6, %s2967_s9  ;;  %p2973_p6 = scmp.lt.s32.totalorder %s2967_s9, %s2967_s9 }
 0x1e3   :  { %v2494_v20 = vadd.f32 %v2493_v15, %v1471_v45  ;;  %v2497_v21 = vadd.f32 %v1432_v19, %v309_v11 }
 0x1e4   :  { %v2496_v22 = vadd.f32 %v2495_v18, %v1473_v46  ;;  %v1650_v24 = vmax.f32 %v2492_v17, 0.0  ;;  %p2974_p7 = por %p2973_p6, %p2972_p5 }
 0x1e5   :  { %v2498_v23 = vadd.f32 %v2497_v21, %v1475_v47  ;;  %v1651_v26 = vmax.f32 %v2494_v20, 0.0 }
 0x1e6   :  { %v1654_v25 = vmax.f32 %v2496_v22, 0.0  ;;  %p2975_p8 = pnand %p2974_p7, %p2968_p4 }
 0x1e7   :  { %v1655_v27 = vmax.f32 %v2498_v23, 0.0 }
 0x1e8   :  { %v1658_v28 = vpack.c.bf16 %v1654_v25, %v1650_v24 }
 0x1e9   :  { %v1659_v30 = vpack.c.bf16 %v1655_v27, %v1651_v26 }
 0x1eb   :  { %1957 = vmatprep.mubr.bf16.mxu0 %v1659_v30 }
 0x1ec   :  { %1958 = vmatmul.mubr.bf16.vlgmr.msra.gmra.mrb[4].mxu0 %v1658_v28 }
 0x1ed   :  { %2472 = vmatpush3.bf16.msra.mxu0 %v2863_v32  ;;  %2487 = vmatprep.mubr.msk.bf16.mxu0 %vm3009_vm1, %v3008_v3 }
 0x1ee   :  { %2473 = vmatprep.subr.bf16.mxu0 %v3008_v3 }
 0x1f0   :  { %v1641_v36 = vpop.f32.mrb[4].mxu1 }
 0x1f1   :  { %v2499_v37 = vadd.f32 %v1641_v36, %v313_v33  ;;  %v1643_v38 = vpop.f32.mrb[5].mxu1  ;;  %2474 = vmatpush3.bf16.msra.mxu0 %v2864_v35 }
 0x1f2   :  { %v2500_v39 = vadd.f32 %v1643_v38, %v317_v34  ;;  %v1645_v40 = vpop.f32.mrb[6].mxu1  ;;  %2475 = vmatprep.subr.bf16.mxu0 %v3008_v3 }
 0x1f3   :  { %v2501_v41 = vadd.f32 %v1645_v40, %v313_v33  ;;  %v1647_v42 = vpop.f32.mrb[7].mxu1  ;;  %v1652_v44 = vmax.f32 %v2499_v37, 0.0 }
 0x1f4   :  { %v2502_v43 = vadd.f32 %v1647_v42, %v317_v34  ;;  %v1653_v45 = vmax.f32 %v2500_v39, 0.0 }
 0x1f5   :  { %v1656_v0 = vmax.f32 %v2501_v41, 0.0  ;;  %2476 = vmatpush3.bf16.msra.mxu0 %v2865_v49 }
 0x1f6   :  { %v1657_v46 = vmax.f32 %v2502_v43, 0.0  ;;  %2477 = vmatprep.subr.bf16.mxu0 %v3008_v3 }
 0x1f7   :  { %v1660_v47 = vpack.c.bf16 %v1656_v0, %v1652_v44 }
 0x1f8   :  { %v1661_v48 = vpack.c.bf16 %v1657_v46, %v1653_v45 }
 0x1f9   :  { %2478 = vmatpush3.bf16.msra.mxu0 %v2866_v50 }
 0x1fa   :  { %1998 = vmatprep.mubr.bf16.mxu1 %v1661_v48  ;;  %2479 = vmatprep.subr.bf16.mxu0 %v3008_v3 }
 0x1fb   :  { %1999 = vmatmul.mubr.bf16.vlgmr.msra.gmra.mrb[8].mxu1 %v1660_v47 }
 0x1fd   :  { %2480 = vmatpush3.bf16.msra.mxu0 %v2867_v51 }
 0x1fe   :  { %2481 = vmatprep.subr.bf16.mxu0 %v3008_v3 }
 0x201   :  { %2482 = vmatpush3.bf16.msra.mxu0 %v2868_v52 }
 0x202   :  { %2483 = vmatprep.subr.bf16.mxu0 %v3008_v3 }
 0x205   :  { %2484 = vmatpush3.bf16.msra.mxu0 %v2869_v53 }
 0x206   :  { %2485 = vmatprep.subr.bf16.mxu0 %v3008_v3 }
 0x209   :  { %2486 = vmatpush3.bf16.msra.mxu0 %v2870_v54 }
 0x2bf   :  { %v2434_v8 = vpop.f32.mrb[4].mxu0 }
 0x2c0   :  { %v2435_v55 = vpop.f32.mrb[5].mxu0 }
 0x2c1   :  { %v2436_v56 = vadd.f32 %v2435_v55, %v2434_v8  ;;  %v2437_v57 = vpop.f32.mrb[6].mxu0 }
 0x2c2   :  { %v2438_v58 = vpop.f32.mrb[7].mxu0 }
 0x2c3   :  { %v2439_v59 = vadd.f32 %v2438_v58, %v2437_v57  ;;  %v1960_v63 = vadd.f32 %v2436_v56, %v2367_v60 }
 0x2c5   :  { %v1963_v5 = vadd.f32 %v2439_v59, %v2367_v60 }
 0x2ce   :  { %v2456_v61 = vpop.f32.mrb[8].mxu1 }
 0x2cf   :  { %v2457_v62 = vpop.f32.mrb[9].mxu1 }
 0x2d0   :  { %v2458_v1 = vadd.f32 %v2457_v62, %v2456_v61  ;;  %v2459_v2 = vpop.f32.mrb[10].mxu1 }
 0x2d1   :  { %v2460_v4 = vpop.f32.mrb[11].mxu1 }
 0x2d2   :  { %v2001_v6 = vadd.f32 %v2458_v1, %v1960_v63  ;;  %v2461_v7 = vadd.f32 %v2460_v4, %v2459_v2 }
 0x2d4   :  { %v2004_v3 = vadd.f32 %v2461_v7, %v1963_v5  ;;  %v2007_v9 = vmax.f32 %v2001_v6, 0.0 }
 0x2d6   :  { %v2008_v10 = vmax.f32 %v2004_v3, 0.0 }
 0x2d8   :  { %v2009_v11 = vpack.c.bf16 %v2008_v10, %v2007_v9 }
 0x2da   :  { %2488 = vmatmul.mubr.bf16.vlgmr.msra.gmra.mrb[8].mxu0 %v2009_v11 }
 0x3ad   :  { %v2115_v13 = vpop.f32.mrb[8].mxu0 }
 0x3ae   :  { %v2116_v14 = vadd.f32 %v2400_v12, %v2115_v13  ;;  %v2489_v15 = vpop.f32.mrb[9].mxu0 }
 0x3af   :  { %v2118_v16 = vpop.f32.mrb[10].mxu0 }
 0x3b0   :  { %2122 = vmax.xlane.f32.xlu0 %v2116_v14  ;;  %v2490_v17 = vpop.f32.mrb[11].mxu0  ;;  %v2119_v18 = vadd.f32 %v2400_v12, %v2118_v16 }
 0x3b4   :  { %2124 = vmax.xlane.f32.xlu0 %v2119_v18 }
 0x43d   :  { %v2123_v19 = vpop.xlane.xlu0 %2122 }
 0x43e   :  { %v2126_v20 = vsub.f32 %v2116_v14, %v2123_v19 }
 0x440   :  { %v2128_v21 = vmul.f32 1.442695, %v2126_v20 }
 0x441   :  { %v2125_v22 = vpop.xlane.xlu0 %2124 }
 0x442   :  { %2871 = vpow2.f32 %v2128_v21  ;;  %v2127_v23 = vsub.f32 %v2119_v18, %v2125_v22 }
 0x444   :  { %v2130_v24 = vmul.f32 1.442695, %v2127_v23 }
 0x446   :  { %2873 = vpow2.f32 %v2130_v24 }
 0x44c   :  { %v2872_v25 = vpop.eup %2871 }
 0x44d   :  { %2132 = vadd.xlane.f32.xlu1 %v2872_v25 }
 0x450   :  { %v2874_v26 = vpop.eup %2873 }
 0x451   :  { %2134 = vadd.xlane.f32.xlu1 %v2874_v26 }
 0x4da   :  { %v2133_v27 = vpop.xlane.xlu1 %2132 }
 0x4db   :  { %2875 = vrcp.f32 %v2133_v27 }
 0x4de   :  { %v2135_v28 = vpop.xlane.xlu1 %2134 }
 0x4df   :  { %2877 = vrcp.f32 %v2135_v28 }
 0x4e5   :  { %v2876_v29 = vpop.eup %2875 }
 0x4e6   :  { %v2138_v31 = vmul.f32 %v2876_v29, %v2872_v25 }
 0x4e9   :  { %v2878_v30 = vpop.eup %2877 }
 0x4ea   :  { %v2139_v32 = vmul.f32 %v2878_v30, %v2874_v26 }
 0x4ec   :  { %v2416_v33 = vpack.c.bf16 %v2139_v32, %v2138_v31 }
 0x4ee   :  { %2417 = vst [vmem:[#allocation10] sm:$0xff] %v2416_v33  }
 0x4ef   :  { %2978 = shalt.err (!%p2975_p8)
}
 0x4f0   :  { %s2979_s12 = scalar_lea.hbm %s3153_s7, 128 }
 0x4f1   :  { %p2980_p9 = scmp.ne.s32.totalorder %s3153_s7, %s2979_s12  ;;  %p2983_p10 = scmp.lt.u32.totalorder %s2979_s12, %s3153_s7 }
 0x4f3   :  { %p2985_p11 = pnand %p2983_p10, %p2980_p9 }
 0x4f5   :  { %2988 = shalt.err (!%p2985_p11)
}
 0x4f6   :  { %2161 = dma.vmem_to_hbm [thread:$0]  %s2156_s6, 128, %s3153_s7, [#allocation4], %s3004_s0, %s3004_s0, %s3005_s15  }
 0x4f7   :  { %2995 = dma.done.wait [#allocation4], 128  }
 0x4f8   :  { %2996 = vsyncadd [#allocation4], 4294967168 }
 0x4f9   :  { %2165 = vsyncpa [#allocation3], 1 }
 0x4fa   :  { %2166 = vsyncpa [#allocation6], 1 }
 0x4fb   :  { %2167 = vsyncpa [#allocation9], 1 }
 0x4fc   :  { %2168 = vsyncpa [#allocation4], 1 }

</bundles_post_ra>
